<compile_context>
chip_gen: v6e
topology: v6e:2x2x1
jax: 0.10.0
libtpu: 0.0.40
codegen_flags: <defaults>
</compile_context>

<pallas_src>
import functools

import jax
import jax.numpy as jnp
import numpy as np
from jax.experimental import pallas as pl
from jax.experimental.pallas import tpu as pltpu


def _ensemble_mlp_kernel(x_ref, w_ref, out_ref, *, layout, alpha):
    """One invocation: full ensemble MLP for this batch tile, members packed on lanes.

    w_ref is the single packed weight slab (R, W); all slices below are static
    (Python-int offsets, 8-row aligned), so they are cheap aligned VMEM loads.
    """
    N = layout["N"]
    W = layout["W"]
    num_hidden = layout["num_hidden"]

    def lrelu(v):
        return jnp.where(v > 0, v, alpha * v)

    # First layer for all members at once: (B, N) @ (N, W) -> (B, W).
    # W1 of member e lives in rows [e, e+3) of column block e, so this one matmul
    # performs the overlapping stencil gather and Linear(3, H) together.
    w1 = w_ref[pl.ds(layout["w1_off"], N), :]
    b1 = w_ref[pl.ds(layout["b1_off"], 1), :]
    h = lrelu(jnp.dot(x_ref[...], w1, preferred_element_type=jnp.float32) + b1)

    # Hidden blocks: (B, W) @ block-diagonal (W, W), one lane-dense MXU pass each.
    # Dropout == identity (eval mode).
    for l in range(num_hidden):
        wh = w_ref[pl.ds(layout[f"wh{l}_off"], W), :]
        bh = w_ref[pl.ds(layout[f"bh{l}_off"], 1), :]
        h = lrelu(jnp.dot(h, wh, preferred_element_type=jnp.float32) + bh)

    # Packed last layers: (B, W) @ (W, W) -> (B, W), lane-dense unmasked store.
    # Only columns [0, E) are non-zero; wrapper slices them out.
    w2 = w_ref[pl.ds(layout["w2_off"], W), :]
    b2 = w_ref[pl.ds(layout["b2_off"], 1), :]
    out_ref[...] = jnp.dot(h, w2, preferred_element_type=jnp.float32) + b2


def pack_ensemble_params(params):
    """Embed per-member weights into ONE padded (R, W) f32 slab (done once, host-side).

    Every sub-block is zero-padded to lane width W = round_up(E*H, 128) and to a
    multiple of 8 rows, and starts at an 8-row-aligned offset, so in-kernel static
    pl.ds slices land on sublane/lane tile boundaries.
    """
    w1, b1, wh, bh, w2, b2 = (np.asarray(p, dtype=np.float32) for p in params)
    E, _, H = w1.shape                      # w1: (E, 3, H)
    num_hidden = wh.shape[0]
    N = E + 2
    EH = E * H
    W = max(128, ((EH + 127) // 128) * 128)

    def rup8(r):
        return ((r + 7) // 8) * 8

    # Fused stencil + first layer: rows [e, e+3), column block e.
    w1_blk = np.zeros((N, W), np.float32)
    for e in range(E):
        w1_blk[e:e + 3, e * H:(e + 1) * H] = w1[e]
    b1_blk = np.zeros((1, W), np.float32)
    b1_blk[0, :EH] = b1.reshape(-1)

    # Block-diagonal hidden layers, padded to (W, W).
    wh_blks, bh_blks = [], []
    for l in range(num_hidden):
        whl = np.zeros((W, W), np.float32)
        for e in range(E):
            whl[e * H:(e + 1) * H, e * H:(e + 1) * H] = wh[l, e]
        wh_blks.append(whl)
        bhl = np.zeros((1, W), np.float32)
        bhl[0, :EH] = bh[l].reshape(-1)
        bh_blks.append(bhl)

    # Final Linear(H, 1) layers packed to (W, W); only columns [0, E) non-zero
    # (lane-dense output, wrapper slices [:, :E]).
    w2_blk = np.zeros((W, W), np.float32)
    for e in range(E):
        w2_blk[e * H:(e + 1) * H, e] = w2[e]
    b2_blk = np.zeros((1, W), np.float32)
    b2_blk[0, :E] = b2

    named = [("w1", w1_blk), ("b1", b1_blk)]
    for l in range(num_hidden):
        named += [(f"wh{l}", wh_blks[l]), (f"bh{l}", bh_blks[l])]
    named += [("w2", w2_blk), ("b2", b2_blk)]

    layout = {"E": E, "H": H, "EH": EH, "N": N, "W": W, "num_hidden": num_hidden}
    pieces = []
    off = 0
    for name, blk in named:
        layout[name + "_off"] = off
        r = blk.shape[0]
        rp = rup8(r)
        padded = np.zeros((rp, W), np.float32)
        padded[:r] = blk
        pieces.append(padded)
        off += rp
    layout["total_rows"] = off
    slab = jnp.asarray(np.concatenate(pieces, axis=0))
    return slab, layout


def ensemble_dense_forward(x, slab, layout, *, alpha, batch_tile=None):
    """x: (B, N) float32. Returns (B, N-2) float32."""
    B, N = x.shape
    E, W, R = layout["E"], layout["W"], layout["total_rows"]
    assert N == layout["N"]

    kernel = functools.partial(_ensemble_mlp_kernel, layout=layout, alpha=alpha)

    if batch_tile is None or batch_tile >= B:
        # Small-batch path: no grid, whole operands resident in VMEM — skips the
        # 1-step pipeline machinery and double buffering entirely.
        out = pl.pallas_call(
            kernel,
            out_shape=jax.ShapeDtypeStruct((B, W), jnp.float32),
            in_specs=[pl.BlockSpec(memory_space=pltpu.MemorySpace.VMEM),   # x
                      pl.BlockSpec(memory_space=pltpu.MemorySpace.VMEM)],  # weight slab
            out_specs=pl.BlockSpec(memory_space=pltpu.MemorySpace.VMEM),
        )(x, slab)
    else:
        # Large-batch path: tile the batch on a parallel grid axis (occupies both
        # TensorCores on v7x); weight slab pinned to block (0, 0) so it is DMA'd once
        # and stays resident while x tiles stream.
        assert B % batch_tile == 0 and batch_tile % 8 == 0
        out = pl.pallas_call(
            kernel,
            out_shape=jax.ShapeDtypeStruct((B, W), jnp.float32),
            grid_spec=pltpu.PrefetchScalarGridSpec(
                num_scalar_prefetch=0,
                grid=(B // batch_tile,),
                in_specs=[pl.BlockSpec((batch_tile, N), lambda i: (i, 0)),
                          pl.BlockSpec((R, W), lambda i: (0, 0))],
                out_specs=pl.BlockSpec((batch_tile, W), lambda i: (i, 0)),
            ),
            compiler_params=pltpu.CompilerParams(
                dimension_semantics=("parallel",)),
        )(x, slab)

    return out[:, :E]


def _init_linear(key, fan_in, fan_out):
    """PyTorch nn.Linear default init: U(-1/sqrt(fan_in), 1/sqrt(fan_in))."""
    kw, kb = jax.random.split(key)
    bound = 1.0 / np.sqrt(fan_in)
    w = jax.random.uniform(kw, (fan_in, fan_out), jnp.float32, -bound, bound)
    b = jax.random.uniform(kb, (fan_out,), jnp.float32, -bound, bound)
    return w, b


def init_ensemble_params(key, num_ensembles, num_layers, hidden_size):
    E, H = num_ensembles, hidden_size
    num_hidden = num_layers - 2
    w1s, b1s, whs, bhs, w2s, b2s = [], [], [], [], [], []
    for _ in range(E):
        key, k1, k2 = jax.random.split(key, 3)
        w, b = _init_linear(k1, 3, H)
        w1s.append(w); b1s.append(b)
        wh_e, bh_e = [], []
        for _ in range(num_hidden):
            key, kh = jax.random.split(key)
            w, b = _init_linear(kh, H, H)
            wh_e.append(w); bh_e.append(b)
        if num_hidden > 0:
            whs.append(jnp.stack(wh_e)); bhs.append(jnp.stack(bh_e))
        w, b = _init_linear(k2, H, 1)
        w2s.append(w[:, 0]); b2s.append(b[0])
    w1 = jnp.stack(w1s)                                    # (E, 3, H)
    b1 = jnp.stack(b1s)                                    # (E, H)
    if num_hidden > 0:
        wh = jnp.transpose(jnp.stack(whs), (1, 0, 2, 3))   # (num_hidden, E, H, H)
        bh = jnp.transpose(jnp.stack(bhs), (1, 0, 2))      # (num_hidden, E, H)
    else:
        wh = jnp.zeros((0, E, H, H), jnp.float32)
        bh = jnp.zeros((0, E, H), jnp.float32)
    w2 = jnp.stack(w2s)                                    # (E, H)
    b2 = jnp.stack(b2s)                                    # (E,)
    return (w1, b1, wh, bh, w2, b2)


def _reference_forward(x, params, *, alpha):
    """Pure-JAX per-member reference for verification."""
    w1, b1, wh, bh, w2, b2 = params
    B, N = x.shape
    E = N - 2
    cols = []
    for e in range(E):
        s = x[:, e:e + 3]
        h = s @ w1[e] + b1[e]
        h = jnp.where(h > 0, h, alpha * h)
        for l in range(wh.shape[0]):
            h = h @ wh[l, e] + bh[l, e]
            h = jnp.where(h > 0, h, alpha * h)
        cols.append(h @ w2[e] + b2[e])
    return jnp.stack(cols, axis=1)


if __name__ == "__main__":
    # Config consistent with the module:
    #   num_layers=3 (one hidden block), output_size=E=4, network_width=H=32
    #   => x has shape (B, E + 2); packed lane width W = E*H = 128.
    B, E, H, NUM_LAYERS = 8, 4, 32, 3
    ALPHA = 0.01  # cfg.act_param for LeakyReLU (cfg.act_type == 'lrelu')

    key = jax.random.PRNGKey(0)
    key, kx = jax.random.split(key)
    x = jax.random.normal(kx, (B, E + 2), jnp.float32)

    params = init_ensemble_params(key, E, NUM_LAYERS, H)
    slab, layout = pack_ensemble_params(params)

    # Small-batch (no-grid) path.
    out = jax.block_until_ready(ensemble_dense_forward(x, slab, layout, alpha=ALPHA))
    ref = _reference_forward(x, params, alpha=ALPHA)
    assert out.shape == (B, E)
    np.testing.assert_allclose(np.asarray(out), np.asarray(ref), rtol=1e-4, atol=1e-4)

    # Larger batch, tiled "parallel" grid path (weights resident, batch streamed;
    # splits across both TensorCores on v7x).
    B2 = 64
    key, kx2 = jax.random.split(key)
    x2 = jax.random.normal(kx2, (B2, E + 2), jnp.float32)
    out2 = jax.block_until_ready(
        ensemble_dense_forward(x2, slab, layout, alpha=ALPHA, batch_tile=32))
    ref2 = _reference_forward(x2, params, alpha=ALPHA)
    np.testing.assert_allclose(np.asarray(out2), np.asarray(ref2), rtol=1e-4, atol=1e-4)

    print("KERNEL_OK")
</pallas_src>

<mosaic_0001>
module attributes {stable_mosaic.version = 11 : i64} {
  func.func @_ensemble_mlp_kernel(%arg0: memref<8x6xf32, #tpu.memory_space<vmem>>, %arg1: memref<288x128xf32, #tpu.memory_space<vmem>>, %arg2: memref<8x128xf32, #tpu.memory_space<vmem>>) attributes {dimension_semantics = [], scalar_prefetch = 0 : i64, scratch_operands = 0 : i64, tpu.core_type = #tpu.core_type<tc>} {
    %c0 = arith.constant 0 : index
    %c0_0 = arith.constant 0 : index
    %0 = vector.load %arg1[%c0, %c0_0] : memref<288x128xf32, #tpu.memory_space<vmem>>, vector<6x128xf32>
    %c8 = arith.constant 8 : index
    %c0_1 = arith.constant 0 : index
    %1 = vector.load %arg1[%c8, %c0_1] : memref<288x128xf32, #tpu.memory_space<vmem>>, vector<1x128xf32>
    %c0_2 = arith.constant 0 : index
    %c0_3 = arith.constant 0 : index
    %2 = vector.load %arg0[%c0_2, %c0_3] : memref<8x6xf32, #tpu.memory_space<vmem>>, vector<8x6xf32>
    %cst = arith.constant dense<0.000000e+00> : vector<8x128xf32>
    %3 = tpu.matmul %2, %0, %cst {dimension_numbers = #tpu.dot_dimension_numbers<[1], [0], [0], [1], [0, 0, 1, 1], [], []>} : vector<8x6xf32>, vector<6x128xf32>, vector<8x128xf32> -> vector<8x128xf32>
    %4 = vector.broadcast %1 : vector<1x128xf32> to vector<8x128xf32>
    %5 = arith.addf %3, %4 : vector<8x128xf32>
    %cst_4 = arith.constant 0.000000e+00 : f32
    %6 = vector.broadcast %cst_4 : f32 to vector<8x128xf32>
    %7 = arith.cmpf ogt, %5, %6 : vector<8x128xf32>
    %cst_5 = arith.constant 0.00999999977 : f32
    %8 = vector.broadcast %cst_5 : f32 to vector<8x128xf32>
    %9 = arith.mulf %8, %5 : vector<8x128xf32>
    %10 = arith.select %7, %5, %9 : vector<8x128xi1>, vector<8x128xf32>
    %c16 = arith.constant 16 : index
    %c0_6 = arith.constant 0 : index
    %11 = vector.load %arg1[%c16, %c0_6] : memref<288x128xf32, #tpu.memory_space<vmem>>, vector<128x128xf32>
    %c144 = arith.constant 144 : index
    %c0_7 = arith.constant 0 : index
    %12 = vector.load %arg1[%c144, %c0_7] : memref<288x128xf32, #tpu.memory_space<vmem>>, vector<1x128xf32>
    %cst_8 = arith.constant dense<0.000000e+00> : vector<8x128xf32>
    %13 = tpu.matmul %10, %11, %cst_8 {dimension_numbers = #tpu.dot_dimension_numbers<[1], [0], [0], [1], [0, 0, 1, 1], [], []>} : vector<8x128xf32>, vector<128x128xf32>, vector<8x128xf32> -> vector<8x128xf32>
    %14 = vector.broadcast %12 : vector<1x128xf32> to vector<8x128xf32>
    %15 = arith.addf %13, %14 : vector<8x128xf32>
    %cst_9 = arith.constant 0.000000e+00 : f32
    %16 = vector.broadcast %cst_9 : f32 to vector<8x128xf32>
    %17 = arith.cmpf ogt, %15, %16 : vector<8x128xf32>
    %cst_10 = arith.constant 0.00999999977 : f32
    %18 = vector.broadcast %cst_10 : f32 to vector<8x128xf32>
    %19 = arith.mulf %18, %15 : vector<8x128xf32>
    %20 = arith.select %17, %15, %19 : vector<8x128xi1>, vector<8x128xf32>
    %c152 = arith.constant 152 : index
    %c0_11 = arith.constant 0 : index
    %21 = vector.load %arg1[%c152, %c0_11] : memref<288x128xf32, #tpu.memory_space<vmem>>, vector<128x128xf32>
    %c280 = arith.constant 280 : index
    %c0_12 = arith.constant 0 : index
    %22 = vector.load %arg1[%c280, %c0_12] : memref<288x128xf32, #tpu.memory_space<vmem>>, vector<1x128xf32>
    %cst_13 = arith.constant dense<0.000000e+00> : vector<8x128xf32>
    %23 = tpu.matmul %20, %21, %cst_13 {dimension_numbers = #tpu.dot_dimension_numbers<[1], [0], [0], [1], [0, 0, 1, 1], [], []>} : vector<8x128xf32>, vector<128x128xf32>, vector<8x128xf32> -> vector<8x128xf32>
    %24 = vector.broadcast %22 : vector<1x128xf32> to vector<8x128xf32>
    %25 = arith.addf %23, %24 : vector<8x128xf32>
    %c0_14 = arith.constant 0 : index
    %c0_15 = arith.constant 0 : index
    %26 = vector.load %arg2[%c0_14, %c0_15] : memref<8x128xf32, #tpu.memory_space<vmem>>, vector<8x128xf32>
    tpu.vector_store %arg2[%c0_14, %c0_15], %25 {strides = array<i32>} : memref<8x128xf32, #tpu.memory_space<vmem>>, vector<8x128xf32>,
    return
  }
}

</mosaic_0001>

<bundles_post_ra>
// kernel: tpu_custom_call.1
= control target key start
LH: loop header
LB: loop body
LE: loop exit
PB: predicated region body
PF: predicated region fallthrough
CT: control target
= control target key end

     0   :  { %7 = vsyncpa [#allocation3], 0  ;;  %s587_s0 = inlined_call_operand.hbm [shape: f32[8,6], index: 0, kind: input, shape index: {}]   ;;  %s588_s1 = inlined_call_operand.hbm [shape: f32[288,128], index: 1, kind: input, shape index: {}]   ;;  %s589_s2 = inlined_call_operand.hbm [shape: f32[8,128], index: 2, kind: output, shape index: {}]  }
   0x1   :  { %8 = vsyncpa [#allocation6], 0 }
   0x2   :  { %9 = vsyncpa [#allocation4], 0  ;;  %s517_s9 = smov [#allocation2]   ;;  %s518_s11 = smov [#allocation5]  }
   0x3   :  { %s16_s10 = sshll.u32 %s517_s9, 4  ;;  %s25_s12 = sshll.u32 %s518_s11, 4  ;;  %s17_s10 = int_to_ptr.vmem [resolvable:$true] %s16_s10  ;;  %s26_s12 = int_to_ptr.vmem [resolvable:$true] %s25_s12 }
   0x4   :  { %s459_s13 = scalar_lea.vmem %s17_s10, 128  ;;  %p464_p1 = scmp.lt.s32.totalorder %s17_s10, %s17_s10 }
   0x5   :  { %p460_p0 = scmp.ne.s32.totalorder %s17_s10, %s459_s13  ;;  %p465_p2 = scmp.lt.s32.totalorder %s459_s13, %s459_s13 }
   0x7   :  { %p466_p3 = por %p465_p2, %p464_p1 }
   0x9   :  { %p467_p4 = pnand %p466_p3, %p460_p0 }
   0xb   :  { %470 = shalt.err (!%p467_p4)
}
   0xc   :  { %19 = dma.hbm_to_vmem [thread:$0]  %s587_s0, 128, %s17_s10, [#allocation3]  }
   0xd   :  { %s479_s16 = scalar_lea.vmem %s26_s12, 4608  ;;  %p484_p6 = scmp.lt.s32.totalorder %s26_s12, %s26_s12 }
   0xe   :  { %p480_p5 = scmp.ne.s32.totalorder %s26_s12, %s479_s16  ;;  %p485_p7 = scmp.lt.s32.totalorder %s479_s16, %s479_s16 }
  0x10   :  { %p486_p8 = por %p485_p7, %p484_p6 }
  0x12   :  { %p487_p9 = pnand %p486_p8, %p480_p5 }
  0x14   :  { %490 = shalt.err (!%p487_p9)
}
  0x15   :  { %s519_s17 = smov 128   ;;  %s520_s18 = smov 8  }
  0x16   :  { %31 = dma.hbm_to_vmem [thread:$0]  %s588_s1, 4608, %s26_s12, [#allocation6], %s519_s17, %s519_s17, %s520_s18  }
  0x17   :  { %511 = dma.done.wait [#allocation3], 128  }
  0x18   :  { %512 = vsyncadd [#allocation3], 4294967168 }
  0x19   :  { %513 = dma.done.wait [#allocation6], 4608  }
  0x1a   :  { %514 = vsyncadd [#allocation6], 4294962688  ;;  %v521_v0 = vmov 0.0   ;;  %vm522_vm0 = vmmov 0   ;;  %vm49_vm1 = vcmask 1045504   ;;  %vm45_vm2 = vcmask 48128  }
  0x1b   :  { %369 = vmatprep.subr.mxu0 %v521_v0  ;;  %371 = vmatprep.mubr.msk.f32.mxu0 %vm522_vm0, %v521_v0  ;;  %v38_v1 = vld [vmem:[#allocation5] sm:$0x3f]  ;;  %v40_v2 = vld [vmem:[#allocation2] sm:$0xff]  ;;  %v141_v3 = vld [vmem:[#allocation5 + $0x88] sm:$0xff]  ;;  %s523_s0 = smov [#allocation7]  }
  0x1c   :  { %374 = vmatprep.subr.mxu1 %v521_v0  ;;  %406 = vmatprep.mubr.msk.f32.mxu1 %vm522_vm0, %v521_v0  ;;  %v140_v4 = vld [vmem:[#allocation5 + $0x80] sm:$0xff]  ;;  %v139_v5 = vld [vmem:[#allocation5 + $0x78] sm:$0xff]  ;;  %v138_v6 = vld [vmem:[#allocation5 + $0x70] sm:$0xff]  ;;  %s318_s1 = sshll.u32 %s523_s0, 4  ;;  %s319_s1 = int_to_ptr.vmem [resolvable:$true] %s318_s1 }
  0x1d   :  { %370 = vmatpush3.msk.msra.mxu0 %vm49_vm1, %v38_v1  ;;  %375 = vmatpush3.msra.mxu1 %v141_v3  ;;  %v137_v7 = vld [vmem:[#allocation5 + $0x68] sm:$0xff]  ;;  %v136_v8 = vld [vmem:[#allocation5 + $0x60] sm:$0xff]  ;;  %v135_v9 = vld [vmem:[#allocation5 + $0x58] sm:$0xff]  ;;  %s491_s21 = scalar_lea.vmem %s319_s1, 128  ;;  %p496_p11 = scmp.lt.s32.totalorder %s319_s1, %s319_s1 }
  0x1e   :  { %372 = vmatmul.mubr.msk.f32.vlgmr.msra.gmra.mxu0 %vm45_vm2, %v40_v2  ;;  %376 = vmatprep.subr.mxu1 %v521_v0  ;;  %v134_v10 = vld [vmem:[#allocation5 + $0x50] sm:$0xff]  ;;  %v133_v11 = vld [vmem:[#allocation5 + $0x48] sm:$0xff]  ;;  %v132_v12 = vld [vmem:[#allocation5 + $0x40] sm:$0xff]  ;;  %p492_p10 = scmp.ne.s32.totalorder %s319_s1, %s491_s21  ;;  %p497_p12 = scmp.lt.s32.totalorder %s491_s21, %s491_s21 }
  0x1f   :  { %377 = vmatpush3.msra.mxu1 %v140_v4  ;;  %409 = vmatprep.subr.mxu0 %v521_v0  ;;  %v131_v13 = vld [vmem:[#allocation5 + $0x38] sm:$0xff]  ;;  %v130_v14 = vld [vmem:[#allocation5 + $0x30] sm:$0xff]  ;;  %v129_v15 = vld [vmem:[#allocation5 + $0x28] sm:$0xff] }
  0x20   :  { %378 = vmatprep.subr.mxu1 %v521_v0  ;;  %441 = vmatprep.mubr.msk.f32.mxu0 %vm522_vm0, %v521_v0  ;;  %v128_v16 = vld [vmem:[#allocation5 + $0x20] sm:$0xff]  ;;  %v127_v17 = vld [vmem:[#allocation5 + $0x18] sm:$0xff]  ;;  %v126_v18 = vld [vmem:[#allocation5 + $0x10] sm:$0xff]  ;;  %p498_p13 = por %p497_p12, %p496_p11 }
  0x21   :  { %379 = vmatpush3.msra.mxu1 %v139_v5  ;;  %v235_v19 = vld [vmem:[#allocation5 + $0x110] sm:$0xff]  ;;  %v234_v20 = vld [vmem:[#allocation5 + $0x108] sm:$0xff]  ;;  %v233_v21 = vld [vmem:[#allocation5 + $0x100] sm:$0xff] }
  0x22   :  { %380 = vmatprep.subr.mxu1 %v521_v0  ;;  %410 = vmatpush3.msra.mxu0 %v235_v19  ;;  %v232_v22 = vld [vmem:[#allocation5 + $0xf8] sm:$0xff]  ;;  %v231_v23 = vld [vmem:[#allocation5 + $0xf0] sm:$0xff]  ;;  %v230_v24 = vld [vmem:[#allocation5 + $0xe8] sm:$0xff]  ;;  %p499_p0 = pnand %p498_p13, %p492_p10 }
  0x23   :  { %381 = vmatpush3.msra.mxu1 %v138_v6  ;;  %411 = vmatprep.subr.mxu0 %v521_v0  ;;  %v229_v25 = vld [vmem:[#allocation5 + $0xe0] sm:$0xff]  ;;  %v228_v26 = vld [vmem:[#allocation5 + $0xd8] sm:$0xff]  ;;  %v227_v27 = vld [vmem:[#allocation5 + $0xd0] sm:$0xff] }
  0x24   :  { %382 = vmatprep.subr.mxu1 %v521_v0  ;;  %412 = vmatpush3.msra.mxu0 %v234_v20  ;;  %v226_v28 = vld [vmem:[#allocation5 + $0xc8] sm:$0xff]  ;;  %v225_v29 = vld [vmem:[#allocation5 + $0xc0] sm:$0xff]  ;;  %v224_v30 = vld [vmem:[#allocation5 + $0xb8] sm:$0xff] }
  0x25   :  { %383 = vmatpush3.msra.mxu1 %v137_v7  ;;  %413 = vmatprep.subr.mxu0 %v521_v0  ;;  %v223_v31 = vld [vmem:[#allocation5 + $0xb0] sm:$0xff]  ;;  %v328_v32 = vld [vmem:[#allocation5 + $0x8] ss:$0 sm:$0xff]  ;;  %v221_v39 = vld [vmem:[#allocation5 + $0xa0] sm:$0xff] }
  0x26   :  { %384 = vmatprep.subr.mxu1 %v521_v0  ;;  %414 = vmatpush3.msra.mxu0 %v233_v21  ;;  %v222_v38 = vld [vmem:[#allocation5 + $0xa8] sm:$0xff]  ;;  %v220_v40 = vld [vmem:[#allocation5 + $0x98] sm:$0xff]  ;;  %v331_v41 = vld [vmem:[#allocation5 + $0x90] ss:$0 sm:$0xff] }
  0x27   :  { %385 = vmatpush3.msra.mxu1 %v136_v8  ;;  %415 = vmatprep.subr.mxu0 %v521_v0  ;;  %v332_v47 = vld [vmem:[#allocation5 + $0x118] ss:$0 sm:$0xff] }
  0x28   :  { %386 = vmatprep.subr.mxu1 %v521_v0  ;;  %416 = vmatpush3.msra.mxu0 %v232_v22 }
  0x29   :  { %387 = vmatpush3.msra.mxu1 %v135_v9  ;;  %417 = vmatprep.subr.mxu0 %v521_v0 }
  0x2a   :  { %388 = vmatprep.subr.mxu1 %v521_v0  ;;  %418 = vmatpush3.msra.mxu0 %v231_v23 }
  0x2b   :  { %389 = vmatpush3.msra.mxu1 %v134_v10  ;;  %419 = vmatprep.subr.mxu0 %v521_v0 }
  0x2c   :  { %390 = vmatprep.subr.mxu1 %v521_v0  ;;  %420 = vmatpush3.msra.mxu0 %v230_v24 }
  0x2d   :  { %391 = vmatpush3.msra.mxu1 %v133_v11  ;;  %421 = vmatprep.subr.mxu0 %v521_v0 }
  0x2e   :  { %392 = vmatprep.subr.mxu1 %v521_v0  ;;  %422 = vmatpush3.msra.mxu0 %v229_v25 }
  0x2f   :  { %393 = vmatpush3.msra.mxu1 %v132_v12  ;;  %423 = vmatprep.subr.mxu0 %v521_v0 }
  0x30   :  { %394 = vmatprep.subr.mxu1 %v521_v0  ;;  %424 = vmatpush3.msra.mxu0 %v228_v26 }
  0x31   :  { %395 = vmatpush3.msra.mxu1 %v131_v13  ;;  %425 = vmatprep.subr.mxu0 %v521_v0 }
  0x32   :  { %396 = vmatprep.subr.mxu1 %v521_v0  ;;  %426 = vmatpush3.msra.mxu0 %v227_v27 }
  0x33   :  { %397 = vmatpush3.msra.mxu1 %v130_v14  ;;  %427 = vmatprep.subr.mxu0 %v521_v0 }
  0x34   :  { %398 = vmatprep.subr.mxu1 %v521_v0  ;;  %428 = vmatpush3.msra.mxu0 %v226_v28 }
  0x35   :  { %399 = vmatpush3.msra.mxu1 %v129_v15  ;;  %429 = vmatprep.subr.mxu0 %v521_v0 }
  0x36   :  { %400 = vmatprep.subr.mxu1 %v521_v0  ;;  %430 = vmatpush3.msra.mxu0 %v225_v29 }
  0x37   :  { %401 = vmatpush3.msra.mxu1 %v128_v16  ;;  %431 = vmatprep.subr.mxu0 %v521_v0 }
  0x38   :  { %402 = vmatprep.subr.mxu1 %v521_v0  ;;  %432 = vmatpush3.msra.mxu0 %v224_v30 }
  0x39   :  { %403 = vmatpush3.msra.mxu1 %v127_v17  ;;  %433 = vmatprep.subr.mxu0 %v521_v0 }
  0x3a   :  { %404 = vmatprep.subr.mxu1 %v521_v0  ;;  %434 = vmatpush3.msra.mxu0 %v223_v31 }
  0x3b   :  { %405 = vmatpush3.msra.mxu1 %v126_v18  ;;  %435 = vmatprep.subr.mxu0 %v521_v0 }
  0x3c   :  { %436 = vmatpush3.msra.mxu0 %v222_v38 }
  0x3d   :  { %437 = vmatprep.subr.mxu0 %v521_v0 }
  0x3e   :  { %438 = vmatpush3.msra.mxu0 %v221_v39 }
  0x3f   :  { %439 = vmatprep.subr.mxu0 %v521_v0 }
  0x40   :  { %440 = vmatpush3.msra.mxu0 %v220_v40 }
  0xde   :  { %v119_v33 = vpop.f32.mrf.mxu0 }
  0xdf   :  { %v120_v34 = vadd.f32 %v328_v32, %v119_v33 }
  0xe0   :  { %v373_v35 = vpop.f32.mrf.mxu0 }
  0xe1   :  { %v124_v36 = vmul.f32 0.01, %v120_v34  ;;  %vm123_vm3 = vcmp.gt.f32.partialorder %v120_v34, 0.0 }
  0xe3   :  { %v125_v37 = vsel %vm123_vm3, %v120_v34, %v124_v36 }
  0xe4   :  { %407 = vmatmul.mubr.f32.vlgmr.msra.gmra.mxu1 %v125_v37 }
 0x1a4   :  { %v213_v42 = vpop.f32.mrf.mxu1 }
 0x1a5   :  { %v214_v43 = vadd.f32 %v331_v41, %v213_v42 }
 0x1a6   :  { %v408_v44 = vpop.f32.mrf.mxu1 }
 0x1a7   :  { %vm217_vm4 = vcmp.gt.f32.partialorder %v214_v43, 0.0  ;;  %v218_v45 = vmul.f32 0.01, %v214_v43 }
 0x1a9   :  { %v219_v46 = vsel %vm217_vm4, %v214_v43, %v218_v45 }
 0x1aa   :  { %442 = vmatmul.mubr.f32.vlgmr.msra.gmra.mxu0 %v219_v46 }
 0x26a   :  { %v307_v48 = vpop.f32.mrf.mxu0 }
 0x26b   :  { %v308_v49 = vadd.f32 %v332_v47, %v307_v48 }
 0x26c   :  { %v443_v50 = vpop.f32.mrf.mxu0 }
 0x26d   :  { %311 = vst [vmem:[#allocation7] sm:$0xff] %v308_v49 }
 0x26e   :  { %502 = shalt.err (!%p499_p0)
}
 0x26f   :  { %321 = dma.vmem_to_hbm [thread:$0]  %s319_s1, 128, %s589_s2, [#allocation4]  }
 0x270   :  { %515 = dma.done.wait [#allocation4], 128  }
 0x271   :  { %516 = vsyncadd [#allocation4], 4294967168 }
 0x272   :  { %325 = vsyncpa [#allocation3], 1 }
 0x273   :  { %326 = vsyncpa [#allocation6], 1 }
 0x274   :  { %327 = vsyncpa [#allocation4], 1 }

</bundles_post_ra>
